<compile_context>
chip_gen: v7x
topology: tpu7x:2x2x1
jax: 0.10.0
libtpu: 0.0.40
codegen_flags: <defaults>
</compile_context>

<pallas_src>
import jax
import jax.numpy as jnp
from jax import lax
from jax.experimental import pallas as pl
from jax.experimental.pallas import tpu as pltpu

KSIZE = 5
PAD = 2
BN_EPS = 1e-5


def _activation(y, atype):
    if atype == "relu":
        return jnp.maximum(y, 0.0)
    if atype == "tanh":
        return jnp.tanh(y)
    if atype == "sigmoid":
        return jax.nn.sigmoid(y)
    if atype == "elu":
        return jnp.where(y > 0, y, jnp.expm1(y))
    raise ValueError(f"unknown atype: {atype}")


def _toeplitz_weight(w_oihw, W):
    """OIHW conv weight -> (KSIZE, (W+4)*Cin, W*Cout) banded matmul weight.

    B[kh, (w+kw)*Cin + ci, w*Cout + co] = w_oihw[co, ci, kh, kw], zero elsewhere.
    The conv's width dimension becomes part of the lane-dense N dimension of the
    MXU matmul, so the kernel needs no im2col / patch relayout at all.
    """
    Cout, Cin, _, _ = w_oihw.shape
    Wp = W + 2 * PAD
    wk = jnp.transpose(w_oihw, (2, 3, 1, 0)).astype(jnp.float32)   # (KH, KW, Cin, Cout)
    kw_idx = jnp.arange(Wp)[:, None] - jnp.arange(W)[None, :]      # (Wp, W): kw = wp - w
    valid = (kw_idx >= 0) & (kw_idx < KSIZE)
    kw_c = jnp.clip(kw_idx, 0, KSIZE - 1)
    b = wk[:, kw_c, :, :]                                          # (KH, Wp, W, Cin, Cout)
    b = b * valid[None, :, :, None, None]
    b = jnp.transpose(b, (0, 1, 3, 2, 4))                          # (KH, Wp, Cin, W, Cout)
    return b.reshape(KSIZE, Wp * Cin, W * Cout).astype(jnp.bfloat16)


def basic_residual_block_conv(x_nchw, w_oihw, bias=None, atype="relu"):
    """Pallas TPU forward: act(bn3(act(bn1(conv5x5(x))) + x)).

    `bias` is accepted for interface parity with nn.Conv2d but intentionally
    unused: bn1 (affine=False, batch stats) cancels any per-channel constant.
    """
    del bias
    N, Cin, H, W = x_nchw.shape
    Cout = w_oihw.shape[0]
    assert Cin == Cout, "identity shortcut requires in_chs == out_chs"
    Hp, Wp = H + 2 * PAD, W + 2 * PAD
    WC = W * Cout            # lane-dense last dim of all activation slabs
    cnt = N * H * W          # per-channel element count for BN batch stats

    # ---- layout glue (plain JAX): NCHW -> lane-dense (N, H, W*C) slabs ----
    x_nhwc = jnp.transpose(x_nchw, (0, 2, 3, 1)).astype(jnp.float32)
    x2 = x_nhwc.reshape(N, H, W * Cin)
    xp2 = jnp.pad(x_nhwc, ((0, 0), (PAD, PAD), (PAD, PAD), (0, 0))).reshape(N, Hp, Wp * Cin)
    wt = _toeplitz_weight(w_oihw, W)                 # (KSIZE, Wp*Cin, W*Cout) bf16

    parallel = pltpu.CompilerParams(dimension_semantics=("parallel",))

    # ---------- pass A: conv (5 bf16 MXU matmuls, f32 acc) + bn1 partial stats ----------
    def conv_stats_kernel(x_ref, w_ref, y_ref, st_ref):
        xw = x_ref[0].astype(jnp.bfloat16)           # (Hp, Wp*Cin), cast once
        acc = jnp.dot(xw[0:H, :], w_ref[0], preferred_element_type=jnp.float32)
        for kh in range(1, KSIZE):                   # sublane-offset slices, no relayout
            acc = acc + jnp.dot(xw[kh:kh + H, :], w_ref[kh],
                                preferred_element_type=jnp.float32)
        y_ref[0] = acc                               # (H, W*Cout) lane-dense store
        st_ref[0] = jnp.concatenate(
            [jnp.sum(acc, axis=0, keepdims=True),
             jnp.sum(acc * acc, axis=0, keepdims=True)], axis=0)

    y2, stats1 = pl.pallas_call(
        conv_stats_kernel,
        out_shape=(jax.ShapeDtypeStruct((N, H, WC), jnp.float32),
                   jax.ShapeDtypeStruct((N, 2, WC), jnp.float32)),
        grid=(N,),
        in_specs=[pl.BlockSpec((1, Hp, Wp * Cin), lambda n: (n, 0, 0)),
                  pl.BlockSpec((KSIZE, Wp * Cin, WC), lambda n: (0, 0, 0))],
        out_specs=[pl.BlockSpec((1, H, WC), lambda n: (n, 0, 0)),
                   pl.BlockSpec((1, 2, WC), lambda n: (n, 0, 0))],
        compiler_params=parallel,
    )(xp2, wt)

    def _bn_coeffs(partial_stats):
        # tiny cross-batch combine: (N,2,W,C) -> per-channel scale/shift, re-tiled to lanes
        s = partial_stats.reshape(N, 2, W, Cout).sum(axis=(0, 2))   # (2, Cout)
        mean = s[0] / cnt
        var = jnp.maximum(s[1] / cnt - mean * mean, 0.0)            # biased variance
        inv = lax.rsqrt(var + BN_EPS)
        scale = jnp.tile(inv, W).reshape(1, WC)
        shift = jnp.tile(-mean * inv, W).reshape(1, WC)
        return scale, shift

    scale1, shift1 = _bn_coeffs(stats1)

    # ---------- pass B: bn1 normalize + act + residual add + bn3 partial stats ----------
    def bn1_act_res_kernel(y_ref, x_ref, sc_ref, sh_ref, r_ref, st_ref):
        r = _activation(y_ref[0] * sc_ref[...] + sh_ref[...], atype) + x_ref[0]
        r_ref[0] = r
        st_ref[0] = jnp.concatenate(
            [jnp.sum(r, axis=0, keepdims=True),
             jnp.sum(r * r, axis=0, keepdims=True)], axis=0)

    r2, stats3 = pl.pallas_call(
        bn1_act_res_kernel,
        out_shape=(jax.ShapeDtypeStruct((N, H, WC), jnp.float32),
                   jax.ShapeDtypeStruct((N, 2, WC), jnp.float32)),
        grid=(N,),
        in_specs=[pl.BlockSpec((1, H, WC), lambda n: (n, 0, 0)),
                  pl.BlockSpec((1, H, WC), lambda n: (n, 0, 0)),
                  pl.BlockSpec((1, WC), lambda n: (0, 0)),
                  pl.BlockSpec((1, WC), lambda n: (0, 0))],
        out_specs=[pl.BlockSpec((1, H, WC), lambda n: (n, 0, 0)),
                   pl.BlockSpec((1, 2, WC), lambda n: (n, 0, 0))],
        compiler_params=parallel,
    )(y2, x2, scale1, shift1)

    scale3, shift3 = _bn_coeffs(stats3)

    # ---------- pass C: bn3 normalize + act ----------
    def bn3_act_kernel(r_ref, sc_ref, sh_ref, o_ref):
        o_ref[0] = _activation(r_ref[0] * sc_ref[...] + sh_ref[...], atype)

    out2 = pl.pallas_call(
        bn3_act_kernel,
        out_shape=jax.ShapeDtypeStruct((N, H, WC), jnp.float32),
        grid=(N,),
        in_specs=[pl.BlockSpec((1, H, WC), lambda n: (n, 0, 0)),
                  pl.BlockSpec((1, WC), lambda n: (0, 0)),
                  pl.BlockSpec((1, WC), lambda n: (0, 0))],
        out_specs=pl.BlockSpec((1, H, WC), lambda n: (n, 0, 0)),
        compiler_params=parallel,
    )(r2, scale3, shift3)

    # TODO(synk): for large H/W add an H-tile grid axis with halo'd conv input blocks
    # so per-step VMEM stays within v7x's 64 MiB and both TensorCores get finer shards.
    out_nhwc = out2.reshape(N, H, W, Cout)
    return jnp.transpose(out_nhwc, (0, 3, 1, 2))     # back to NCHW


def _reference(x, w, b, atype="relu"):
    conv = lax.conv_general_dilated(
        x, w, window_strides=(1, 1), padding=((PAD, PAD), (PAD, PAD)),
        dimension_numbers=("NCHW", "OIHW", "NCHW"),
        precision=lax.Precision.HIGHEST,
    ) + b[None, :, None, None]

    def bn(t):
        m = jnp.mean(t, axis=(0, 2, 3), keepdims=True)
        v = jnp.mean(jnp.square(t - m), axis=(0, 2, 3), keepdims=True)
        return (t - m) / jnp.sqrt(v + BN_EPS)

    out = _activation(bn(conv), atype)
    out = out + x                       # identity shortcut
    return _activation(bn(out), atype)


if __name__ == "__main__":
    key = jax.random.PRNGKey(0)
    k_x, k_w, k_b = jax.random.split(key, 3)

    # Residual shortcut requires in_chs == out_chs; C=8 makes W*C = 128 lane-dense.
    N, C, H, W = 2, 8, 16, 16
    ATYPE = "relu"

    x = jax.random.normal(k_x, (N, C, H, W), dtype=jnp.float32)
    w = 0.1 * jax.random.normal(k_w, (C, C, KSIZE, KSIZE), dtype=jnp.float32)
    b = 0.1 * jax.random.normal(k_b, (C,), dtype=jnp.float32)

    out = basic_residual_block_conv(x, w, b, atype=ATYPE)
    out = jax.block_until_ready(out)

    ref = _reference(x, w, b, atype=ATYPE)
    assert out.shape == (N, C, H, W)
    # bf16 MXU inputs with f32 accumulation -> slightly looser tolerance than pure f32.
    assert jnp.allclose(out, ref, atol=2e-2, rtol=2e-2), "mismatch vs JAX reference"

    print("KERNEL_OK")
</pallas_src>

<mosaic_0001>
module attributes {stable_mosaic.version = 11 : i64} {
  func.func @conv_stats_kernel(%arg0: i32, %arg1: memref<1x20x160xf32, #tpu.memory_space<vmem>>, %arg2: memref<5x160x128xbf16, #tpu.memory_space<vmem>>, %arg3: memref<1x16x128xf32, #tpu.memory_space<vmem>>, %arg4: memref<1x2x128xf32, #tpu.memory_space<vmem>>) attributes {dimension_semantics = [#tpu.dimension_semantics<parallel>], iteration_bounds = array<i64: 2>, scalar_prefetch = 0 : i64, scratch_operands = 0 : i64, tpu.core_type = #tpu.core_type<tc>, window_params = [{transform_indices = @transform_0, window_bounds = array<i64: 1, 20, 160>}, {pipeline_mode = #tpu.pipeline_mode<synchronous>, transform_indices = @transform_1, window_bounds = array<i64: 5, 160, 128>}, {transform_indices = @transform_2, window_bounds = array<i64: 1, 16, 128>}, {transform_indices = @transform_3, window_bounds = array<i64: 1, 2, 128>}]} {
    %c0 = arith.constant 0 : index
    %c0_0 = arith.constant 0 : index
    %c0_1 = arith.constant 0 : index
    %0 = vector.load %arg1[%c0, %c0_0, %c0_1] : memref<1x20x160xf32, #tpu.memory_space<vmem>>, vector<1x20x160xf32>
    %1 = vector.shape_cast %0 : vector<1x20x160xf32> to vector<20x160xf32>
    %2 = arith.truncf %1 : vector<20x160xf32> to vector<20x160xbf16>
    %3 = vector.extract_strided_slice %2 {offsets = [0, 0], sizes = [16, 160], strides = [1, 1]} : vector<20x160xbf16> to vector<16x160xbf16>
    %c0_2 = arith.constant 0 : index
    %c0_3 = arith.constant 0 : index
    %c0_4 = arith.constant 0 : index
    %4 = vector.load %arg2[%c0_2, %c0_3, %c0_4] : memref<5x160x128xbf16, #tpu.memory_space<vmem>>, vector<1x160x128xbf16>
    %5 = vector.shape_cast %4 : vector<1x160x128xbf16> to vector<160x128xbf16>
    %cst = arith.constant dense<0.000000e+00> : vector<16x128xf32>
    %6 = tpu.matmul %3, %5, %cst {dimension_numbers = #tpu.dot_dimension_numbers<[1], [0], [0], [1], [0, 0, 1, 1], [], []>} : vector<16x160xbf16>, vector<160x128xbf16>, vector<16x128xf32> -> vector<16x128xf32>
    %7 = vector.extract_strided_slice %2 {offsets = [1, 0], sizes = [16, 160], strides = [1, 1]} : vector<20x160xbf16> to vector<16x160xbf16>
    %c1 = arith.constant 1 : index
    %c0_5 = arith.constant 0 : index
    %c0_6 = arith.constant 0 : index
    %8 = vector.load %arg2[%c1, %c0_5, %c0_6] : memref<5x160x128xbf16, #tpu.memory_space<vmem>>, vector<1x160x128xbf16>
    %9 = vector.shape_cast %8 : vector<1x160x128xbf16> to vector<160x128xbf16>
    %cst_7 = arith.constant dense<0.000000e+00> : vector<16x128xf32>
    %10 = tpu.matmul %7, %9, %cst_7 {dimension_numbers = #tpu.dot_dimension_numbers<[1], [0], [0], [1], [0, 0, 1, 1], [], []>} : vector<16x160xbf16>, vector<160x128xbf16>, vector<16x128xf32> -> vector<16x128xf32>
    %11 = arith.addf %6, %10 : vector<16x128xf32>
    %12 = vector.extract_strided_slice %2 {offsets = [2, 0], sizes = [16, 160], strides = [1, 1]} : vector<20x160xbf16> to vector<16x160xbf16>
    %c2 = arith.constant 2 : index
    %c0_8 = arith.constant 0 : index
    %c0_9 = arith.constant 0 : index
    %13 = vector.load %arg2[%c2, %c0_8, %c0_9] : memref<5x160x128xbf16, #tpu.memory_space<vmem>>, vector<1x160x128xbf16>
    %14 = vector.shape_cast %13 : vector<1x160x128xbf16> to vector<160x128xbf16>
    %cst_10 = arith.constant dense<0.000000e+00> : vector<16x128xf32>
    %15 = tpu.matmul %12, %14, %cst_10 {dimension_numbers = #tpu.dot_dimension_numbers<[1], [0], [0], [1], [0, 0, 1, 1], [], []>} : vector<16x160xbf16>, vector<160x128xbf16>, vector<16x128xf32> -> vector<16x128xf32>
    %16 = arith.addf %11, %15 : vector<16x128xf32>
    %17 = vector.extract_strided_slice %2 {offsets = [3, 0], sizes = [16, 160], strides = [1, 1]} : vector<20x160xbf16> to vector<16x160xbf16>
    %c3 = arith.constant 3 : index
    %c0_11 = arith.constant 0 : index
    %c0_12 = arith.constant 0 : index
    %18 = vector.load %arg2[%c3, %c0_11, %c0_12] : memref<5x160x128xbf16, #tpu.memory_space<vmem>>, vector<1x160x128xbf16>
    %19 = vector.shape_cast %18 : vector<1x160x128xbf16> to vector<160x128xbf16>
    %cst_13 = arith.constant dense<0.000000e+00> : vector<16x128xf32>
    %20 = tpu.matmul %17, %19, %cst_13 {dimension_numbers = #tpu.dot_dimension_numbers<[1], [0], [0], [1], [0, 0, 1, 1], [], []>} : vector<16x160xbf16>, vector<160x128xbf16>, vector<16x128xf32> -> vector<16x128xf32>
    %21 = arith.addf %16, %20 : vector<16x128xf32>
    %22 = vector.extract_strided_slice %2 {offsets = [4, 0], sizes = [16, 160], strides = [1, 1]} : vector<20x160xbf16> to vector<16x160xbf16>
    %c4 = arith.constant 4 : index
    %c0_14 = arith.constant 0 : index
    %c0_15 = arith.constant 0 : index
    %23 = vector.load %arg2[%c4, %c0_14, %c0_15] : memref<5x160x128xbf16, #tpu.memory_space<vmem>>, vector<1x160x128xbf16>
    %24 = vector.shape_cast %23 : vector<1x160x128xbf16> to vector<160x128xbf16>
    %cst_16 = arith.constant dense<0.000000e+00> : vector<16x128xf32>
    %25 = tpu.matmul %22, %24, %cst_16 {dimension_numbers = #tpu.dot_dimension_numbers<[1], [0], [0], [1], [0, 0, 1, 1], [], []>} : vector<16x160xbf16>, vector<160x128xbf16>, vector<16x128xf32> -> vector<16x128xf32>
    %26 = arith.addf %21, %25 : vector<16x128xf32>
    %c0_17 = arith.constant 0 : index
    %c0_18 = arith.constant 0 : index
    %c0_19 = arith.constant 0 : index
    %27 = vector.load %arg3[%c0_17, %c0_18, %c0_19] : memref<1x16x128xf32, #tpu.memory_space<vmem>>, vector<1x16x128xf32>
    %28 = vector.shape_cast %27 : vector<1x16x128xf32> to vector<16x128xf32>
    %29 = vector.shape_cast %26 : vector<16x128xf32> to vector<1x16x128xf32>
    tpu.vector_store %arg3[%c0_17, %c0_18, %c0_19], %29 {strides = array<i32>} : memref<1x16x128xf32, #tpu.memory_space<vmem>>, vector<1x16x128xf32>,
    %cst_20 = arith.constant dense<0.000000e+00> : vector<128xf32>
    %30 = vector.multi_reduction <add>, %26, %cst_20 [0] : vector<16x128xf32> to vector<128xf32>
    %31 = vector.shape_cast %30 : vector<128xf32> to vector<1x128xf32>
    %32 = arith.mulf %26, %26 : vector<16x128xf32>
    %cst_21 = arith.constant dense<0.000000e+00> : vector<128xf32>
    %33 = vector.multi_reduction <add>, %32, %cst_21 [0] : vector<16x128xf32> to vector<128xf32>
    %34 = vector.shape_cast %33 : vector<128xf32> to vector<1x128xf32>
    %35 = tpu.concatenate %31, %34 in 0 : vector<1x128xf32>, vector<1x128xf32> -> vector<2x128xf32>
    %c0_22 = arith.constant 0 : index
    %c0_23 = arith.constant 0 : index
    %c0_24 = arith.constant 0 : index
    %36 = vector.load %arg4[%c0_22, %c0_23, %c0_24] : memref<1x2x128xf32, #tpu.memory_space<vmem>>, vector<1x2x128xf32>
    %37 = vector.shape_cast %36 : vector<1x2x128xf32> to vector<2x128xf32>
    %38 = vector.shape_cast %35 : vector<2x128xf32> to vector<1x2x128xf32>
    tpu.vector_store %arg4[%c0_22, %c0_23, %c0_24], %38 {strides = array<i32>} : memref<1x2x128xf32, #tpu.memory_space<vmem>>, vector<1x2x128xf32>,
    return
  }
  func.func @transform_0(%arg0: i32) -> (i32, i32, i32) {
    %c0_i32 = arith.constant 0 : i32
    %c0_i32_0 = arith.constant 0 : i32
    %c0_i32_1 = arith.constant 0 : i32
    return %arg0, %c0_i32, %c0_i32_0 : i32, i32, i32
  }
  func.func @transform_1(%arg0: i32) -> (i32, i32, i32) {
    %c0_i32 = arith.constant 0 : i32
    %c0_i32_0 = arith.constant 0 : i32
    %c0_i32_1 = arith.constant 0 : i32
    %c0_i32_2 = arith.constant 0 : i32
    return %c0_i32, %c0_i32_0, %c0_i32_1 : i32, i32, i32
  }
  func.func @transform_2(%arg0: i32) -> (i32, i32, i32) {
    %c0_i32 = arith.constant 0 : i32
    %c0_i32_0 = arith.constant 0 : i32
    %c0_i32_1 = arith.constant 0 : i32
    return %arg0, %c0_i32, %c0_i32_0 : i32, i32, i32
  }
  func.func @transform_3(%arg0: i32) -> (i32, i32, i32) {
    %c0_i32 = arith.constant 0 : i32
    %c0_i32_0 = arith.constant 0 : i32
    %c0_i32_1 = arith.constant 0 : i32
    return %arg0, %c0_i32, %c0_i32_0 : i32, i32, i32
  }
}

</mosaic_0001>

<bundles_post_ra>
// kernel: tpu_custom_call.1
= control target key start
LH: loop header
LB: loop body
LE: loop exit
PB: predicated region body
PF: predicated region fallthrough
CT: control target
= control target key end

     0   :  { %9 = vsyncpa [#allocation3], 0  ;;  %s1690_s0 = inlined_call_operand.vmem [shape: f32[2,20,160], index: 0, kind: input, shape index: {}]   ;;  %s1691_s1 = inlined_call_operand.hbm [shape: bf16[5,160,128], index: 1, kind: input, shape index: {}]   ;;  %s1692_s2 = inlined_call_operand.hbm [shape: f32[2,16,128], index: 2, kind: output, shape index: {0}]   ;;  %s1693_s3 = inlined_call_operand.hbm [shape: f32[2,2,128], index: 3, kind: output, shape index: {1}]  }
   0x1   :  { %10 = vsyncpa [#allocation4], 0 }
   0x2   :  { %12 = vsyncpa [#allocation4 + $0x1], 0 }
   0x3   :  { %13 = vsyncpa [#allocation7], 0 }
   0x4   :  { %15 = vsyncpa [#allocation7 + $0x1], 0  ;;  %s1414_s12 = smov 0   ;;  %s1416_s13 = smov 0  }
   0x5   :  { %s1418_s14 = smov 0   ;;  %s1420_s15 = smov 0  }
   0x6 LB: > { %s1435_s16 = sadd.s32 4294967295, %s1384_s15   ;;  %s1061_s17 = sadd.s32 4294967294, %s1384_s15   ;;  %s1384_s15 = sphi %s1420_s15, %s1709_s15   ;;  %s1380_s14 = sphi %s1418_s14, %s1708_s14   ;;  %s1376_s13 = sphi %s1416_s13, %s1707_s13   ;;  %s1372_s12 = sphi %s1414_s12, %s1706_s12  }
   0x7   : > { %s1439_s18 = sadd.s32 1, %s1384_s15   ;;  %s75_s19 = sadd.s32 1, %s1380_s14 }
   0x8   : > { %s72_s20 = ssub.s32 %s1384_s15, %s1439_s18  ;;  %p85_p0 = scmp.ne.s32.totalorder %s1380_s14, %s1376_s13 }
   0x9   : > { %p73_p1 = scmp.eq.s32.totalorder %s72_s20, 0  ;;  %p86_p2 = scmp.eq.s32.totalorder %s1435_s16, 1 }
   0xa   : > { %p91_p3 = scmp.ne.s32.totalorder %s1376_s13, %s1372_s12  ;;  %p92_p4 = scmp.eq.s32.totalorder %s1061_s17, 1 }
   0xb   : > { %s1450_s21 = scalar_select %p73_p1, %s1380_s14, %s75_s19  }
   0xc   : > { %p1452_p5 = por %p86_p2, %p85_p0  ;;  %p1456_p6 = por %p92_p4, %p91_p3 }
   0xd   : > { %p1062_p7 = scmp.ge.s32.totalorder %s1384_s15, 1  ;;  %p125_p8 = scmp.lt.s32.totalorder %s1384_s15, 3 }
   0xe   : > { %s1697_s22 = scalar_select %p1452_p5, 1, 0 }
   0xf   : > { %s1698_s23 = scalar_select %p1456_p6, 1, 0 }
  0x10   : > { %p1694_p9 = scmp.eq.s32.totalorder %s1435_s16, 0  ;;  %p1463_p10 = pnand %p1062_p7, %p125_p8 }
  0x11   : > { %s1386_s25 = smov [#allocation2]   ;;  %s1258_s30 = scalar_lea.hbm %s1691_s1, 6400 }
  0x12   : > { %s1699_s24 = scalar_select %p1463_p10, 1, 0 }
  0x13   : > { %s137_s26 = sshll.u32 %s1386_s25, 4  ;;  %p1156_p11 = pneg %p1463_p10  ;;  %s138_s26 = int_to_ptr.vmem [resolvable:$true] %s137_s26 }
  0x14   : > { %p1259_p13 = scmp.ne.s32.totalorder %s1691_s1, %s1258_s30  ;;  %p1265_p3 = scmp.lt.u32.totalorder %s1258_s30, %s1691_s1 }
  0x15   : > { %p1471_p12 = pnand %p1694_p9, %p1156_p11 }
  0x17   : > { %p1260_p0 = pneg %p1471_p12 }
  0x19   : > { %p1261_p1 = pnand %p1260_p0, %p1259_p13 }
  0x1b   : > { %p1262_p2 = pneg %p1261_p1 }
  0x1d   : > { %p1267_p4 = pnand %p1265_p3, %p1262_p2 }
  0x1f   : > { %1270 = shalt.err (!%p1267_p4)
}
  0x20   : > { %s1271_s8 = scalar_lea.vmem %s138_s26, 6400  ;;  %p1279_p9 = scmp.lt.s32.totalorder %s138_s26, %s138_s26 }
  0x21   : > { %p1272_p7 = scmp.ne.s32.totalorder %s138_s26, %s1271_s8  ;;  %p1280_p6 = scmp.lt.s32.totalorder %s1271_s8, %s1271_s8 }
  0x23   : > { %p1274_p8 = pnand %p1272_p7, %p1260_p0  ;;  %p1281_p5 = por %p1280_p6, %p1279_p9 }
  0x25   : > { %p1275_p11 = pneg %p1274_p8 }
  0x27   : > { %p1282_p10 = pnand %p1281_p5, %p1275_p11 }
  0x29   : > { %1285 = shalt.err (!%p1282_p10)
}
  0x2a   : > { %s1387_s9 = smov 64   ;;  %s1388_s10 = smov 4  }
  0x2b   : > { %1159 = dma.hbm_to_vmem [thread:$0]  (!%p1471_p12), %s1691_s1, 6400, %s138_s26, [#allocation3], %s1387_s9, %s1387_s9, %s1388_s10  }
  0x2c   : > { %p1701_p13 = scmp.ne.s32.totalorder %s1699_s24, 0 }
  0x2d   : > { %p1702_p1 = scmp.eq.s32.totalorder (!%p1701_p13), %s1435_s16, 0 }
  0x2e   : > { %161 = sbr.rel (%p1701_p13) target bundleno = 433 (0x1b1), region = 28 }
  0x35   : > { %1359 = dma.done.wait (%p1702_p1), [#allocation3], 6400   ;;  %p1703_p0 = pmov %p1702_p1 }
  0x36   : > { %v1389_v0 = vmov 0   ;;  %v1208_v1 = vld [vmem:[#allocation2 + $0x50] sm:$0xff]   ;;  %v1209_v2 = vld [vmem:[#allocation2 + $0xa0] sm:$0xff]   ;;  %v1210_v3 = vld [vmem:[#allocation2 + $0x58] sm:$0xff]   ;;  %p190_p5 = scmp.lt.s32.totalorder %s1435_s16, 1  ;;  %vm506_vm0 = vcmask 1046528  }
  0x37   : > { %1361 = vsyncadd (%p1703_p0), [#allocation3], 4294960896  ;;  %337 = vmatprep.subr.bf16.mxu1 %v1389_v0  ;;  %577 = vmatprep.subr.bf16.mxu0 %v1389_v0  ;;  %v1211_v4 = vld [vmem:[#allocation2 + $0xa8] sm:$0xff]   ;;  %v1212_v5 = vld [vmem:[#allocation2 + $0x60] sm:$0xff]   ;;  %vm333_vm1 = vcmask 261120   ;;  %vm788_vm4 = vcmask 1045504  }
  0x38   : > { %338 = vmatpush1.bf16.msra.mxu1 %v1208_v1  ;;  %578 = vmatpush1.bf16.msra.mxu0 %v1209_v2  ;;  %v1213_v6 = vld [vmem:[#allocation2 + $0xb0] sm:$0xff]   ;;  %s191_s19 = scalar_select %p190_p5, %s1435_s16, 1  ;;  %v1214_v7 = vld [vmem:[#allocation2 + $0x68] sm:$0xff]   ;;  %v1215_v8 = vld [vmem:[#allocation2 + $0xb8] sm:$0xff]   ;;  %vm247_vm2 = vsmask.f32 7424 }
  0x39   : > { %339 = vmatprep.subr.bf16.mxu1 %v1389_v0  ;;  %579 = vmatprep.subr.bf16.mxu0 %v1389_v0  ;;  %v1216_v9 = vld [vmem:[#allocation2 + $0x70] sm:$0xff]   ;;  %v1217_v10 = vld [vmem:[#allocation2 + $0xc0] sm:$0xff]   ;;  %v1218_v11 = vld [vmem:[#allocation2 + $0x78] sm:$0xff]   ;;  %vm641_vm3 = vsmask.f32 6400  ;;  %s1607_s27 = sand.u32 1, %s1376_s13  }
  0x3a   : > { %s1147_s20 = smul.u32 48, %s191_s19  ;;  %v1219_v12 = vld [vmem:[#allocation2 + $0xc8] sm:$0xff]   ;;  %v1220_v13 = vld [vmem:[#allocation2 + $0x80] sm:$0xff]   ;;  %v1221_v17 = vld [vmem:[#allocation2 + $0xd0] sm:$0xff]   ;;  %s1067_s28 = sshll.u32 %s1607_s27, 4 }
  0x3b   : > { %v1222_v32 = vld [vmem:[#allocation2 + $0x88] sm:$0xff]   ;;  %v1223_v35 = vld [vmem:[#allocation2 + $0xd8] sm:$0xff]   ;;  %v1224_v37 = vld [vmem:[#allocation2 + $0x90] sm:$0xff]   ;;  %s182_s29 = scalar_lea.vmem [#allocation5], %s1067_s28  ;;  %s1132_s4 = sshll.u32 %s1435_s16, 8 }
  0x3c   : > { %340 = vmatpush1.bf16.msra.mxu1 %v1210_v3  ;;  %580 = vmatpush1.bf16.msra.mxu0 %v1211_v4  ;;  %s194_s26 = scalar_lea.vmem %s1690_s0, %s1147_s20  ;;  %v1225_v43 = vld [vmem:[#allocation2 + $0xe0] sm:$0xff]   ;;  %v1226_v44 = vld [vmem:[#allocation2 + $0x98] sm:$0xff]   ;;  %v1227_v46 = vld [vmem:[#allocation2 + $0xe8] sm:$0xff]   ;;  %s942_s30 = sshll.u32 %s182_s29, 4  ;;  %s1611_s30 = int_to_ptr.vmem [resolvable:$true] %s942_s30 }
  0x3d   : > { %341 = vmatprep.subr.bf16.mxu1 %v1389_v0  ;;  %581 = vmatprep.subr.bf16.mxu0 %v1389_v0  ;;  %v197_v14 = vld [vmem:[%s194_s26 + $0x8] sm:$0xff]  ;;  %v199_v15 = vld [vmem:[%s194_s26 + $0x18] sm:$0xff]  ;;  %v196_v20 = vld [vmem:[%s194_s26] sm:$0xff]  ;;  %s1616_s7 = scalar_lea.hbm %s1692_s2, %s1132_s4  ;;  %s924_s8 = scalar_lea.sflag [#allocation4], %s1607_s27 }
  0x3e   : > { %v201_v16 = vld [vmem:[%s194_s26 + $0x28] sm:$0xf]  ;;  %v1514_v18 = vpack.c.bf16 %v199_v15, %v197_v14  ;;  %v198_v21 = vld [vmem:[%s194_s26 + $0x10] sm:$0xff]  ;;  %v200_v22 = vld [vmem:[%s194_s26 + $0x20] sm:$0xf]  ;;  %s1286_s9 = scalar_lea.vmem %s1611_s30, 256 }
  0x3f   : > { %v1516_v19 = vpack.c.bf16 %v201_v16, %v201_v16  ;;  %v1518_v23 = vpack.c.bf16 %v198_v21, %v196_v20  ;;  %v1527_v31 = vpack.c.bf16 %v200_v22, %v200_v22  ;;  %v1228_v55 = vld [vmem:[#allocation2] sm:$0xff]   ;;  %v1229_v59 = vld [vmem:[#allocation2 + $0xf0] sm:$0xff]   ;;  %v1230_v62 = vld [vmem:[#allocation2 + $0x8] sm:$0xff]   ;;  %p1287_p6 = scmp.ne.s32.totalorder %s1611_s30, %s1286_s9  ;;  %p1704_p9 = scmp.ne.s32.totalorder %s1697_s22, 0 }
  0x40   : > { %342 = vmatpush1.bf16.msra.mxu1 %v1212_v5  ;;  %582 = vmatpush1.bf16.msra.mxu0 %v1213_v6  ;;  %v261_v24 = vshrl.u32 %v1514_v18, 16  ;;  %v263_v25 = vshll.u32 %v1514_v18, 16  ;;  %v510_v27 = vrot.slane %v1514_v18, 1  ;;  %v1231_v2 = vld [vmem:[#allocation2 + $0xf8] sm:$0xff]   ;;  %v1232_v3 = vld [vmem:[#allocation2 + $0x10] sm:$0xff]   ;;  %v1233_v4 = vld [vmem:[#allocation2 + $0x100] sm:$0xff]  }
  0x41   : > { %343 = vmatprep.subr.bf16.mxu1 %v1389_v0  ;;  %583 = vmatprep.subr.bf16.mxu0 %v1389_v0  ;;  %v268_v26 = vshll.u32 %v1516_v19, 16  ;;  %v511_v28 = vrot.slane %v1516_v19, 1  ;;  %v251_v34 = vshll.u32 %v1518_v23, 16  ;;  %v249_v39 = vshrl.u32 %v1518_v23, 16  ;;  %v1234_v5 = vld [vmem:[#allocation2 + $0x18] sm:$0xff]   ;;  %v1235_v6 = vld [vmem:[#allocation2 + $0x108] sm:$0xff]   ;;  %p1288_p10 = pnand %p1287_p6, %p1704_p9 }
  0x42   : > { %v265_v29 = vrot.slane %v263_v25, 1  ;;  %v256_v40 = vshll.u32 %v1527_v31, 16  ;;  %v654_v42 = vshrl.u32 %v1516_v19, 16  ;;  %v651_v45 = vrot.slane %v261_v24, 1  ;;  %v1243_v14 = vld [vmem:[#allocation2 + $0x128] sm:$0xff]   ;;  %v1244_v16 = vld [vmem:[#allocation2 + $0x40] sm:$0xff]  }
  0x43   : > { %v270_v30 = vrot.slane %v268_v26, 1  ;;  %v512_v33 = vsel %vm506_vm0, %v510_v27, %v511_v28  ;;  %v253_v41 = vrot.slane %v251_v34, 1  ;;  %v657_v47 = vrot.slane %v268_v26, 2  ;;  %v1247_v26 = vld [vmem:[#allocation2 + $0x138] sm:$0xff]   ;;  %p1289_p12 = pneg %p1288_p10  ;;  %s1390_s10 = smov [#allocation5]  }
  0x44   : > { %344 = vmatpush1.bf16.msra.mxu1 %v1214_v7  ;;  %584 = vmatpush1.bf16.msra.mxu0 %v1215_v8  ;;  %v266_v36 = vor.u32 %v265_v29, %v261_v24  ;;  %v258_v48 = vrot.slane %v256_v40, 1  ;;  %v652_v50 = vrot.slane %v263_v25, 2  ;;  %v656_v51 = vrot.slane %v654_v42, 1  ;;  %v1236_v7 = vld [vmem:[#allocation2 + $0x20] sm:$0xff]   ;;  %v1237_v8 = vld [vmem:[#allocation2 + $0x110] sm:$0xff]   ;;  %v1246_v25 = vld [vmem:[#allocation2 + $0x48] sm:$0xff]  }
  0x45   : > { %345 = vmatprep.subr.bf16.mxu1 %v1389_v0  ;;  %585 = vmatprep.subr.bf16.mxu0 %v1389_v0  ;;  %v254_v49 = vor.u32 %v253_v41, %v249_v39  ;;  %v507_v52 = vrot.slane %v1518_v23, 1  ;;  %v508_v53 = vrot.slane %v1527_v31, 1  ;;  %v789_v60 = vrot.slane %v1518_v23, 2  ;;  %s1290_s11 = sshll.u32 %s1390_s10, 4  ;;  %s1291_s11 = int_to_ptr.vmem [resolvable:$false] %s1290_s11 }
  0x46   : > { %1102 = vmatprep.mubr.msk.bf16.mxu0 %vm333_vm1, %v512_v33  ;;  %v271_v38 = vsel %vm247_vm2, %v266_v36, %v270_v30  ;;  %v653_v56 = vor.u32 %v652_v50, %v651_v45  ;;  %v658_v57 = vor.u32 %v657_v47, %v656_v51  ;;  %v790_v61 = vrot.slane %v1527_v31, 2  ;;  %v1254_v36 = vld [vmem:[#allocation2 + $0x170] sm:$0xff]   ;;  %s1292_s17 = scalar_lea.vmem %s1291_s11, 512  ;;  %p1293_p2 = scmp.lt.s32.totalorder %s1611_s30, %s1291_s11 }
  0x47   : > { %1080 = vmatprep.mubr.msk.bf16.mxu1 %vm333_vm1, %v271_v38  ;;  %v259_v54 = vsel %vm247_vm2, %v254_v49, %v258_v48  ;;  %v509_v58 = vsel %vm506_vm0, %v507_v52, %v508_v53  ;;  %v645_v15 = vshrl.u32 %v1527_v31, 16  ;;  %v642_v20 = vrot.slane %v249_v39, 1  ;;  %v1256_v38 = vld [vmem:[#allocation2 + $0x180] sm:$0xff]   ;;  %v1257_v39 = vld [vmem:[#allocation2 + $0x188] sm:$0xff]   ;;  %p1294_p3 = scmp.lt.s32.totalorder %s1292_s17, %s1286_s9 }
  0x48   : > { %346 = vmatpush1.bf16.msra.mxu1 %v1216_v9  ;;  %586 = vmatpush1.bf16.msra.mxu0 %v1217_v10  ;;  %v659_v63 = vsel %vm641_vm3, %v653_v56, %v658_v57  ;;  %v1559_v1 = vsel %vm788_vm4, %v789_v60, %v790_v61  ;;  %v1238_v9 = vld [vmem:[#allocation2 + $0x28] sm:$0xff]   ;;  %v1239_v10 = vld [vmem:[#allocation2 + $0x118] sm:$0xff]   ;;  %v643_v21 = vrot.slane %v251_v34, 2  ;;  %v648_v24 = vrot.slane %v256_v40, 2 }
  0x49   : > { %347 = vmatprep.subr.bf16.mxu1 %v1389_v0  ;;  %587 = vmatprep.subr.bf16.mxu0 %v1389_v0  ;;  %v647_v22 = vrot.slane %v645_v15, 1  ;;  %v792_v29 = vrot.slane %v1514_v18, 2  ;;  %v793_v30 = vrot.slane %v1516_v19, 2  ;;  %v1249_v34 = vld [vmem:[#allocation2 + $0x148] sm:$0xff]   ;;  %v1251_v19 = vld [vmem:[#allocation2 + $0x158] sm:$0xff]   ;;  %p1295_p4 = por %p1294_p3, %p1293_p2 }
  0x4a   : > { %v644_v27 = vor.u32 %v643_v21, %v642_v20 }
  0x4b   : > { %v649_v28 = vor.u32 %v648_v24, %v647_v22  ;;  %v794_v33 = vsel %vm788_vm4, %v792_v29, %v793_v30  ;;  %p1296_p7 = pnand %p1295_p4, %p1289_p12 }
  0x4c   : > { %348 = vmatpush1.bf16.msra.mxu1 %v1218_v11  ;;  %588 = vmatpush1.bf16.msra.mxu0 %v1219_v12  ;;  %v1240_v11 = vld [vmem:[#allocation2 + $0x30] sm:$0xff]   ;;  %v1241_v12 = vld [vmem:[#allocation2 + $0x120] sm:$0xff]  }
  0x4d   : > { %349 = vmatprep.subr.bf16.mxu1 %v1389_v0  ;;  %589 = vmatprep.subr.bf16.mxu0 %v1389_v0  ;;  %v650_v31 = vsel %vm641_vm3, %v644_v27, %v649_v28 }
  0x50   : > { %350 = vmatpush1.bf16.msra.mxu1 %v1220_v13  ;;  %590 = vmatpush1.bf16.msra.mxu0 %v1221_v17  ;;  %v1242_v13 = vld [vmem:[#allocation2 + $0x38] sm:$0xff]   ;;  %v1245_v17 = vld [vmem:[#allocation2 + $0x130] sm:$0xff]  }
  0x51   : > { %351 = vmatprep.subr.bf16.mxu1 %v1389_v0  ;;  %591 = vmatprep.subr.bf16.mxu0 %v1389_v0 }
  0x54   : > { %352 = vmatpush1.bf16.msra.mxu1 %v1222_v32  ;;  %592 = vmatpush1.bf16.msra.mxu0 %v1223_v35  ;;  %v1248_v32 = vld [vmem:[#allocation2 + $0x140] sm:$0xff]  }
  0x55   : > { %353 = vmatprep.subr.bf16.mxu1 %v1389_v0  ;;  %593 = vmatprep.subr.bf16.mxu0 %v1389_v0  ;;  %v1252_v35 = vld [vmem:[#allocation2 + $0x160] sm:$0xff]  }
  0x58   : > { %354 = vmatpush1.bf16.msra.mxu1 %v1224_v37  ;;  %594 = vmatpush1.bf16.msra.mxu0 %v1225_v43  ;;  %v1255_v37 = vld [vmem:[#allocation2 + $0x178] sm:$0xff]  }
  0x59   : > { %355 = vmatprep.subr.bf16.mxu1 %v1389_v0  ;;  %595 = vmatprep.subr.bf16.mxu0 %v1389_v0 }
  0x5c   : > { %356 = vmatpush1.bf16.msra.mxu1 %v1226_v44  ;;  %596 = vmatpush1.bf16.msra.mxu0 %v1227_v46 }
  0x5d   : > { %440 = vmatprep.subr.bf16.mxu1 %v1389_v0  ;;  %724 = vmatprep.subr.bf16.mxu0 %v1389_v0 }
  0x5f   : > { %370 = vmatmul.mubr.bf16.vlgmr.msra.gmra.mrb[0].mxu1 %v259_v54  ;;  %610 = vmatmul.mubr.bf16.vlgmr.msra.gmra.mrb[0].mxu0 %v509_v58 }
  0x60   : > { %441 = vmatpush1.bf16.msra.mxu1 %v1228_v55  ;;  %725 = vmatpush1.bf16.msra.mxu0 %v1229_v59 }
  0x61   : > { %442 = vmatprep.subr.bf16.mxu1 %v1389_v0  ;;  %726 = vmatprep.subr.bf16.mxu0 %v1389_v0 }
  0x62   : > { %1091 = vmatprep.mubr.msk.bf16.mxu1 %vm333_vm1, %v1514_v18  ;;  %1113 = vmatprep.mubr.msk.bf16.mxu0 %vm333_vm1, %v659_v63  ;;  %v1250_v18 = vld [vmem:[#allocation2 + $0x150] sm:$0xff]  }
  0x64   : > { %443 = vmatpush1.bf16.msra.mxu1 %v1230_v62  ;;  %727 = vmatpush1.bf16.msra.mxu0 %v1231_v2 }
  0x65   : > { %444 = vmatprep.subr.bf16.mxu1 %v1389_v0  ;;  %728 = vmatprep.subr.bf16.mxu0 %v1389_v0 }
  0x68   : > { %445 = vmatpush1.bf16.msra.mxu1 %v1232_v3  ;;  %729 = vmatpush1.bf16.msra.mxu0 %v1233_v4 }
  0x69   : > { %446 = vmatprep.subr.bf16.mxu1 %v1389_v0  ;;  %730 = vmatprep.subr.bf16.mxu0 %v1389_v0 }
  0x6c   : > { %447 = vmatpush1.bf16.msra.mxu1 %v1234_v5  ;;  %731 = vmatpush1.bf16.msra.mxu0 %v1235_v6 }
  0x6d   : > { %448 = vmatprep.subr.bf16.mxu1 %v1389_v0  ;;  %732 = vmatprep.subr.bf16.mxu0 %v1389_v0 }
  0x70   : > { %449 = vmatpush1.bf16.msra.mxu1 %v1236_v7  ;;  %733 = vmatpush1.bf16.msra.mxu0 %v1237_v8 }
  0x71   : > { %450 = vmatprep.subr.bf16.mxu1 %v1389_v0  ;;  %734 = vmatprep.subr.bf16.mxu0 %v1389_v0 }
  0x74   : > { %451 = vmatpush1.bf16.msra.mxu1 %v1238_v9  ;;  %735 = vmatpush1.bf16.msra.mxu0 %v1239_v10 }
  0x75   : > { %452 = vmatprep.subr.bf16.mxu1 %v1389_v0  ;;  %736 = vmatprep.subr.bf16.mxu0 %v1389_v0 }
  0x78   : > { %453 = vmatpush1.bf16.msra.mxu1 %v1240_v11  ;;  %737 = vmatpush1.bf16.msra.mxu0 %v1241_v12 }
  0x79   : > { %454 = vmatprep.subr.bf16.mxu1 %v1389_v0  ;;  %738 = vmatprep.subr.bf16.mxu0 %v1389_v0 }
  0x7c   : > { %455 = vmatpush1.bf16.msra.mxu1 %v1242_v13  ;;  %739 = vmatpush1.bf16.msra.mxu0 %v1243_v14 }
  0x7d   : > { %456 = vmatprep.subr.bf16.mxu1 %v1389_v0  ;;  %740 = vmatprep.subr.bf16.mxu0 %v1389_v0 }
  0x80   : > { %457 = vmatpush1.bf16.msra.mxu1 %v1244_v16  ;;  %741 = vmatpush1.bf16.msra.mxu0 %v1245_v17 }
  0x81   : > { %458 = vmatprep.subr.bf16.mxu1 %v1389_v0  ;;  %742 = vmatprep.subr.bf16.mxu0 %v1389_v0 }
  0x84   : > { %459 = vmatpush1.bf16.msra.mxu1 %v1246_v25  ;;  %743 = vmatpush1.bf16.msra.mxu0 %v1247_v26 }
  0x85   : > { %859 = vmatprep.subr.bf16.mxu0 %v1389_v0 }
  0x87   : > { %473 = vmatmul.mubr.bf16.vlgmr.msra.gmra.mrb[0].mxu1 %v1518_v23  ;;  %757 = vmatmul.mubr.bf16.vlgmr.msra.gmra.mrb[0].mxu0 %v650_v31  ;;  %v1253_v23 = vld [vmem:[#allocation2 + $0x168] sm:$0xff]  }
  0x88   : > { %860 = vmatpush1.bf16.msra.mxu0 %v1248_v32  ;;  %1124 = vmatprep.mubr.msk.bf16.mxu0 %vm333_vm1, %v794_v33 }
  0x89   : > { %861 = vmatprep.subr.bf16.mxu0 %v1389_v0 }
  0x8c   : > { %862 = vmatpush1.bf16.msra.mxu0 %v1249_v34 }
  0x8d   : > { %863 = vmatprep.subr.bf16.mxu0 %v1389_v0 }
  0x90   : > { %864 = vmatpush1.bf16.msra.mxu0 %v1250_v18 }
  0x91   : > { %865 = vmatprep.subr.bf16.mxu0 %v1389_v0 }
  0x94   : > { %866 = vmatpush1.bf16.msra.mxu0 %v1251_v19 }
  0x95   : > { %867 = vmatprep.subr.bf16.mxu0 %v1389_v0 }
  0x98   : > { %868 = vmatpush1.bf16.msra.mxu0 %v1252_v35 }
  0x99   : > { %869 = vmatprep.subr.bf16.mxu0 %v1389_v0 }
  0x9c   : > { %870 = vmatpush1.bf16.msra.mxu0 %v1253_v23 }
  0x9d   : > { %871 = vmatprep.subr.bf16.mxu0 %v1389_v0 }
  0xa0   : > { %872 = vmatpush1.bf16.msra.mxu0 %v1254_v36 }
  0xa1   : > { %873 = vmatprep.subr.bf16.mxu0 %v1389_v0 }
  0xa4   : > { %874 = vmatpush1.bf16.msra.mxu0 %v1255_v37 }
  0xa5   : > { %875 = vmatprep.subr.bf16.mxu0 %v1389_v0 }
  0xa8   : > { %876 = vmatpush1.bf16.msra.mxu0 %v1256_v38 }
  0xa9   : > { %877 = vmatprep.subr.bf16.mxu0 %v1389_v0 }
  0xac   : > { %878 = vmatpush1.bf16.msra.mxu0 %v1257_v39 }
  0xaf   : > { %892 = vmatmul.mubr.bf16.vlgmr.msra.gmra.mrb[0].mxu0 %v1559_v1 }
 0x15a   : > { %v474_v40 = vpop.f32.mrb[0].mxu1 }
 0x15b   : > { %v476_v41 = vpop.f32.mrb[1].mxu1 }
 0x15c   : > { %v477_v42 = vpop.f32.mrb[2].mxu1 }
 0x15d   : > { %v479_v43 = vpop.f32.mrb[3].mxu1 }
 0x182   : > { %v893_v44 = vpop.f32.mrb[0].mxu0 }
 0x183   : > { %v1133_v45 = vadd.f32 %v893_v44, %v474_v40  ;;  %v895_v0 = vpop.f32.mrb[1].mxu0 }
 0x184   : > { %v896_v46 = vpop.f32.mrb[2].mxu0 }
 0x185   : > { %902 = vst [vmem:[%s182_s29] sm:$0xff] %v1133_v45  ;;  %v1134_v47 = vadd.f32 %v896_v46, %v477_v42  ;;  %v898_v48 = vpop.f32.mrb[3].mxu0  ;;  %v911_v49 = vmul.f32 %v1133_v45, %v1133_v45 }
 0x187   : > { %903 = vst [vmem:[%s182_s29 + $0x8] sm:$0xff] %v1134_v47  ;;  %v904_v50 = vadd.f32 %v1134_v47, %v1133_v45  ;;  %v912_v51 = vmul.f32 %v1134_v47, %v1134_v47 }
 0x188   : > { %1299 = shalt.err (!%p1296_p7)
}
 0x189   : > { %s1300_s19 = scalar_lea.hbm %s1616_s7, 256  ;;  %s1304_s25 = scalar_lea.hbm %s1692_s2, 512 }
 0x18a   : > { %p1301_p8 = scmp.ne.s32.totalorder %s1616_s7, %s1300_s19  ;;  %p1305_p1 = scmp.lt.u32.totalorder %s1616_s7, %s1692_s2 }
 0x18b   : > { %p1306_p0 = scmp.lt.u32.totalorder %s1304_s25, %s1300_s19  ;;  %p1308_p6 = scmp.lt.u32.totalorder %s1300_s19, %s1616_s7 }
 0x18c   : > { %p1302_p11 = pnand %p1301_p8, %p1704_p9 }
 0x18d   : > { %p1307_p5 = por %p1306_p0, %p1305_p1 }
 0x18e   : > { %p1303_p13 = pneg %p1302_p11 }
 0x18f   : > { %p1309_p10 = por %p1308_p6, %p1307_p5 }
 0x191   : > { %p1310_p12 = pnand %p1309_p10, %p1303_p13 }
 0x193   : > { %1313 = shalt.err (!%p1310_p12)
}
 0x194   : > { %s1391_s29 = smov 128   ;;  %s1392_s4 = smov 8   ;;  %v905_v52 = vrot.slane %v904_v50, 4  ;;  %v913_v53 = vadd.f32 %v912_v51, %v911_v49  ;;  %vm920_vm5 = vcmask 1040384  }
 0x195   : > { %1152 = dma.vmem_to_hbm [thread:$0]  (%p1704_p9), %s1611_s30, 256, %s1616_s7, %s924_s8, %s1391_s29, %s1391_s29, %s1392_s4  }
 0x196   : > { %v906_v54 = vadd.f32 %v905_v52, %v904_v50  ;;  %v914_v55 = vrot.slane %v913_v53, 4  ;;  %s1068_s5 = sshll.u32 %s1607_s27, 1  ;;  %s1129_s6 = sshll.u32 %s1435_s16, 5 }
 0x197   : > { %s189_s9 = scalar_lea.vmem [#allocation6], %s1068_s5  ;;  %s1647_s8 = scalar_lea.hbm %s1693_s3, %s1129_s6 }
 0x198   : > { %v907_v56 = vrot.slane %v906_v54, 2  ;;  %v915_v57 = vadd.f32 %v914_v55, %v913_v53  ;;  %s958_s10 = sshll.u32 %s189_s9, 4  ;;  %s929_s11 = scalar_lea.sflag [#allocation7], %s1607_s27  ;;  %s1649_s10 = int_to_ptr.vmem [resolvable:$true] %s958_s10 }
 0x199   : > { %s1314_s17 = scalar_lea.vmem %s1649_s10, 32  ;;  %s1393_s16 = smov [#allocation6]  }
 0x19a   : > { %v908_v58 = vadd.f32 %v907_v56, %v906_v54  ;;  %v916_v59 = vrot.slane %v915_v57, 2  ;;  %p1315_p2 = scmp.ne.s32.totalorder %s1649_s10, %s1314_s17  ;;  %s1318_s19 = sshll.u32 %s1393_s16, 4  ;;  %s1319_s19 = int_to_ptr.vmem [resolvable:$false] %s1318_s19 }
 0x19b   : > { %s1320_s20 = scalar_lea.vmem %s1319_s19, 64  ;;  %p1321_p7 = scmp.lt.s32.totalorder %s1649_s10, %s1319_s19 }
 0x19c   : > { %v909_v60 = vrot.slane %v908_v58, 1  ;;  %v917_v61 = vadd.f32 %v916_v59, %v915_v57  ;;  %p1316_p3 = pnand %p1315_p2, %p1704_p9  ;;  %p1322_p8 = scmp.lt.s32.totalorder %s1320_s20, %s1314_s17 }
 0x19e   : > { %v918_v62 = vrot.slane %v917_v61, 1  ;;  %v910_v63 = vadd.f32 %v909_v60, %v908_v58  ;;  %p1317_p4 = pneg %p1316_p3  ;;  %p1323_p11 = por %p1322_p8, %p1321_p7 }
 0x1a0   : > { %v919_v1 = vadd.f32 %v918_v62, %v917_v61  ;;  %p1324_p13 = pnand %p1323_p11, %p1317_p4 }
 0x1a2   : > { %v921_v2 = vsel %vm920_vm5, %v910_v63, %v919_v1 }
 0x1a3   : > { %922 = vst [vmem:[%s189_s9] sm:$0x3] %v921_v2 }
 0x1a4   : > { %1327 = shalt.err (!%p1324_p13)
}
 0x1a5   : > { %s1328_s27 = scalar_lea.hbm %s1647_s8, 32  ;;  %s1332_s26 = scalar_lea.hbm %s1693_s3, 64 }
 0x1a6   : > { %p1329_p1 = scmp.ne.s32.totalorder %s1647_s8, %s1328_s27  ;;  %p1333_p6 = scmp.lt.u32.totalorder %s1647_s8, %s1693_s3 }
 0x1a7   : > { %p1334_p10 = scmp.lt.u32.totalorder %s1332_s26, %s1328_s27  ;;  %p1336_p2 = scmp.lt.u32.totalorder %s1328_s27, %s1647_s8 }
 0x1a8   : > { %p1330_p0 = pnand %p1329_p1, %p1704_p9 }
 0x1a9   : > { %p1335_p12 = por %p1334_p10, %p1333_p6 }
 0x1aa   : > { %p1331_p5 = pneg %p1330_p0 }
 0x1ab   : > { %p1337_p3 = por %p1336_p2, %p1335_p12 }
 0x1ad   : > { %p1338_p4 = pnand %p1337_p3, %p1331_p5 }
 0x1af   : > { %1341 = shalt.err (!%p1338_p4)
}
 0x1b0   : > { %1153 = dma.vmem_to_hbm [thread:$0]  (%p1704_p9), %s1649_s10, 32, %s1647_s8, %s929_s11  }
 0x1b1 PF: > { %p1169_p7 = scmp.ge.s32.totalorder %s1384_s15, 2  ;;  %s970_s4 = sand.u32 1, %s1372_s12  }
 0x1b2   : > { %p1705_p8 = scmp.ne.s32.totalorder %s1698_s23, 0  ;;  %s971_s5 = scalar_lea.sflag [#allocation4], %s970_s4 }
 0x1b4   : > { %p1161_p11 = pnand %p1169_p7, %p1705_p8 }
 0x1b6   : > { %1363 = dma.done.wait (!%p1161_p11), %s971_s5, 256  }
 0x1b7   : > { %1365 = vsyncadd (!%p1161_p11), %s971_s5, 4294967040  ;;  %s980_s6 = scalar_lea.sflag [#allocation7], %s970_s4 }
 0x1b8   : > { %1367 = dma.done.wait (!%p1161_p11), %s980_s6, 32  }
 0x1b9   : > { %1369 = vsyncadd (!%p1161_p11), %s980_s6, 4294967264  ;;  %p18_p9 = scmp.ge.s32.totalorder %s1439_s18, 4   ;;  %s1706_s12 = smov %s1376_s13 }
 0x1ba   : > { %s1707_s13 = smov %s1380_s14  ;;  %s1708_s14 = smov %s1450_s21 }
 0x1bb   : > { %s1709_s15 = smov %s1439_s18  ;;  %20 = sbr.rel (!%p18_p9) target bundleno = 6 (0x6), region = 89 }
 0x1c2   :  { %985 = vsyncpa [#allocation3], 1 }
 0x1c3   :  { %987 = vsyncpa [#allocation3 + $0x1], 1 }
 0x1c4   :  { %988 = vsyncpa [#allocation4], 1 }
 0x1c5   :  { %990 = vsyncpa [#allocation4 + $0x1], 1 }
 0x1c6   :  { %991 = vsyncpa [#allocation7], 1 }
 0x1c7   :  { %993 = vsyncpa [#allocation7 + $0x1], 1 }

</bundles_post_ra>
